<compile_context>
chip_gen: v6e
topology: v6e:2x2x1
jax: 0.10.0
libtpu: 0.0.40
codegen_flags: <defaults>
</compile_context>

<pallas_src>
import jax
import jax.numpy as jnp
from jax.experimental import pallas as pl
from jax.experimental.pallas import tpu as pltpu


def _noise_adder_kernel(w_ref, x_ref, n_ref, o_ref):
    # w_ref : VMEM (C, 1)       per-channel scale (float32)
    # x_ref : VMEM (1, C, Sblk) one (batch, spatial-tile) slab, all channels
    # n_ref : VMEM (1, 1, Sblk) noise for this slab, shared across channels
    # o_ref : VMEM (1, C, Sblk)
    w = w_ref[...][None, :, :]                      # (1, C, 1)
    n = n_ref[...].astype(jnp.float32)              # (1, 1, Sblk)
    x = x_ref[...].astype(jnp.float32)              # (1, C, Sblk)
    o_ref[...] = (x + w * n).astype(o_ref.dtype)


def _pick_spatial_block(S, C, itemsize, target_bytes=4 << 20):
    """Largest multiple of 128 that divides S with C*Sblk*itemsize <= target."""
    if S % 128 != 0:
        # Fall back to the full spatial extent (always a legal block shape).
        return S
    max_lanes = max(128, (target_bytes // max(1, C * itemsize)) // 128 * 128)
    if max_lanes >= S:
        return S
    n128 = S // 128
    best = 1
    k = 1
    while k * k <= n128:
        if n128 % k == 0:
            if k * 128 <= max_lanes:
                best = max(best, k)
            other = n128 // k
            if other * 128 <= max_lanes:
                best = max(best, other)
        k += 1
    return best * 128


def noise_adder_3d(x, weight, noise=None, *, key=None):
    """x: (B, C, D, H, W); weight: (C,); noise: (B, 1, D, H, W) or None."""
    B, C, D, H, W = x.shape
    if noise is None:
        assert key is not None, "need a PRNG key when noise is None"
        # TODO(synk): fuse noise generation in-kernel (pltpu.prng_seed +
        # prng_random_bits + Box-Muller into a VMEM scratch) to skip one full
        # HBM write + read of the noise tensor.
        noise = jax.random.normal(key, (B, 1, D, H, W), dtype=x.dtype)

    S = D * H * W
    x2 = x.reshape(B, C, S)                         # lane-dense spatial axis
    n2 = noise.reshape(B, 1, S)
    w2 = weight.astype(jnp.float32).reshape(C, 1)   # f32 for clean VMEM math

    sblk = _pick_spatial_block(S, C, x.dtype.itemsize)
    n_spatial = S // sblk

    out = pl.pallas_call(
        _noise_adder_kernel,
        out_shape=jax.ShapeDtypeStruct((B, C, S), x.dtype),
        grid_spec=pltpu.PrefetchScalarGridSpec(
            num_scalar_prefetch=0,
            grid=(B, n_spatial),
            in_specs=[
                # Weight: constant block index -> fetched once, reused.
                pl.BlockSpec((C, 1), lambda b, s: (0, 0)),
                # x: all channels of one (batch, spatial-tile) slab.
                pl.BlockSpec((1, C, sblk), lambda b, s: (b, 0, s)),
                # noise: one slab shared across every channel of this step.
                pl.BlockSpec((1, 1, sblk), lambda b, s: (b, 0, s)),
            ],
            out_specs=pl.BlockSpec((1, C, sblk), lambda b, s: (b, 0, s)),
        ),
        compiler_params=pltpu.CompilerParams(
            dimension_semantics=("parallel", "parallel"),
            vmem_limit_bytes=48 * 1024 * 1024,
        ),
    )(w2, x2, n2)

    return out.reshape(B, C, D, H, W)


if __name__ == "__main__":
    B, C, D, H, W = 2, 4, 4, 8, 8

    key = jax.random.PRNGKey(0)
    kx, kw, kn = jax.random.split(key, 3)

    x = jax.random.normal(kx, (B, C, D, H, W), dtype=jnp.float32)
    # nn.Parameter(torch.zeros(channels)) -> shape (C,); use a deterministic
    # nonzero init so the multiply path is actually exercised.
    weight = jax.random.normal(kw, (C,), dtype=jnp.float32)
    noise = jax.random.normal(kn, (B, 1, D, H, W), dtype=jnp.float32)

    out = noise_adder_3d(x, weight, noise)
    out = jax.block_until_ready(out)

    # Pure-JAX reference check (same semantics as the PyTorch module).
    ref = x + weight.reshape(1, C, 1, 1, 1) * noise
    assert out.shape == x.shape and out.dtype == x.dtype
    assert jnp.allclose(out, ref, atol=1e-6, rtol=1e-6)

    print("KERNEL_OK")
</pallas_src>

<mosaic_0001>
module attributes {stable_mosaic.version = 11 : i64} {
  func.func @_noise_adder_kernel(%arg0: i32, %arg1: i32, %arg2: memref<4x1xf32, #tpu.memory_space<vmem>>, %arg3: memref<1x4x256xf32, #tpu.memory_space<vmem>>, %arg4: memref<1x1x256xf32, #tpu.memory_space<vmem>>, %arg5: memref<1x4x256xf32, #tpu.memory_space<vmem>>) attributes {dimension_semantics = [#tpu.dimension_semantics<parallel>, #tpu.dimension_semantics<parallel>], iteration_bounds = array<i64: 2, 1>, scalar_prefetch = 0 : i64, scratch_operands = 0 : i64, tpu.core_type = #tpu.core_type<tc>, window_params = [{pipeline_mode = #tpu.pipeline_mode<synchronous>, transform_indices = @transform_0, window_bounds = array<i64: 4, 1>}, {transform_indices = @transform_1, window_bounds = array<i64: 1, 4, 256>}, {transform_indices = @transform_2, window_bounds = array<i64: 1, 1, 256>}, {transform_indices = @transform_3, window_bounds = array<i64: 1, 4, 256>}]} {
    %c0 = arith.constant 0 : index
    %c0_0 = arith.constant 0 : index
    %0 = vector.load %arg2[%c0, %c0_0] : memref<4x1xf32, #tpu.memory_space<vmem>>, vector<4x1xf32>
    %1 = vector.shape_cast %0 : vector<4x1xf32> to vector<1x4x1xf32>
    %c0_1 = arith.constant 0 : index
    %c0_2 = arith.constant 0 : index
    %c0_3 = arith.constant 0 : index
    %2 = vector.load %arg4[%c0_1, %c0_2, %c0_3] : memref<1x1x256xf32, #tpu.memory_space<vmem>>, vector<1x1x256xf32>
    %c0_4 = arith.constant 0 : index
    %c0_5 = arith.constant 0 : index
    %c0_6 = arith.constant 0 : index
    %3 = vector.load %arg3[%c0_4, %c0_5, %c0_6] : memref<1x4x256xf32, #tpu.memory_space<vmem>>, vector<1x4x256xf32>
    %4 = vector.broadcast %1 : vector<1x4x1xf32> to vector<1x4x256xf32>
    %5 = vector.broadcast %2 : vector<1x1x256xf32> to vector<1x4x256xf32>
    %6 = arith.mulf %4, %5 : vector<1x4x256xf32>
    %7 = arith.addf %3, %6 : vector<1x4x256xf32>
    %c0_7 = arith.constant 0 : index
    %c0_8 = arith.constant 0 : index
    %c0_9 = arith.constant 0 : index
    %8 = vector.load %arg5[%c0_7, %c0_8, %c0_9] : memref<1x4x256xf32, #tpu.memory_space<vmem>>, vector<1x4x256xf32>
    tpu.vector_store %arg5[%c0_7, %c0_8, %c0_9], %7 {strides = array<i32>} : memref<1x4x256xf32, #tpu.memory_space<vmem>>, vector<1x4x256xf32>,
    return
  }
  func.func @transform_0(%arg0: i32, %arg1: i32) -> (i32, i32) {
    %c0_i32 = arith.constant 0 : i32
    %c0_i32_0 = arith.constant 0 : i32
    %c0_i32_1 = arith.constant 0 : i32
    return %c0_i32, %c0_i32_0 : i32, i32
  }
  func.func @transform_1(%arg0: i32, %arg1: i32) -> (i32, i32, i32) {
    %c0_i32 = arith.constant 0 : i32
    %c0_i32_0 = arith.constant 0 : i32
    return %arg0, %c0_i32, %arg1 : i32, i32, i32
  }
  func.func @transform_2(%arg0: i32, %arg1: i32) -> (i32, i32, i32) {
    %c0_i32 = arith.constant 0 : i32
    %c0_i32_0 = arith.constant 0 : i32
    return %arg0, %c0_i32, %arg1 : i32, i32, i32
  }
  func.func @transform_3(%arg0: i32, %arg1: i32) -> (i32, i32, i32) {
    %c0_i32 = arith.constant 0 : i32
    %c0_i32_0 = arith.constant 0 : i32
    return %arg0, %c0_i32, %arg1 : i32, i32, i32
  }
}

</mosaic_0001>

<bundles_post_ra>
// kernel: tpu_custom_call.1
= control target key start
LH: loop header
LB: loop body
LE: loop exit
PB: predicated region body
PF: predicated region fallthrough
CT: control target
= control target key end

     0   :  { %8 = vsyncpa [#allocation3], 0  ;;  %s740_s0 = inlined_call_operand.vmem [shape: f32[4,1], index: 0, kind: input, shape index: {}]   ;;  %s741_s1 = inlined_call_operand.hbm [shape: f32[2,4,256], index: 1, kind: input, shape index: {}]   ;;  %s742_s2 = inlined_call_operand.vmem [shape: f32[2,1,256], index: 2, kind: input, shape index: {}]   ;;  %s743_s3 = inlined_call_operand.hbm [shape: f32[2,4,256], index: 3, kind: output, shape index: {}]  }
   0x1   :  { %10 = vsyncpa [#allocation3 + $0x1], 0 }
   0x2   :  { %11 = vsyncpa [#allocation4], 0 }
   0x3   :  { %13 = vsyncpa [#allocation4 + $0x1], 0  ;;  %s598_s12 = smov 0   ;;  %s600_s13 = smov 0  }
   0x4   :  { %s602_s14 = smov 0   ;;  %s604_s15 = smov 0  }
   0x5   :  { %s606_s16 = smov 0   ;;  %s608_s17 = smov 0  }
   0x6 LB: > { %s383_s18 = sadd.s32 4294967295, %s573_s17   ;;  %s384_s19 = sadd.s32 4294967294, %s573_s17   ;;  %s573_s17 = sphi %s608_s17, %s19_s17   ;;  %s569_s16 = sphi %s606_s16, %s755_s16   ;;  %s565_s15 = sphi %s604_s15, %s754_s15   ;;  %s561_s14 = sphi %s602_s14, %s753_s14   ;;  %s557_s13 = sphi %s600_s13, %s752_s13   ;;  %s553_s12 = sphi %s598_s12, %s751_s12  }
   0x7   : > { %s31_s20 = sadd.s32 1, %s569_s16  ;;  %s61_s21 = sadd.s32 1, %s561_s14 }
   0x8   : > { %p33_p0 = scmp.ge.s32.totalorder %s31_s20, 2  ;;  %p68_p1 = scmp.ne.s32.totalorder %s561_s14, %s557_s13 }
   0x9   : > { %p69_p2 = scmp.eq.s32.totalorder %s573_s17, 0  ;;  %p74_p3 = scmp.ne.s32.totalorder %s557_s13, %s553_s12 }
   0xa   : > { %s757_s20 = smov (%p33_p0, %s31_s20), 0  ;;  %p75_p5 = scmp.eq.s32.totalorder %s383_s18, 0 }
   0xb   : > { %p639_p4 = por %p69_p2, %p68_p1  ;;  %s56_s23 = ssub.s32 %s569_s16, %s757_s20 }
   0xc   : > { %p128_p6 = scmp.eq.s32.totalorder %s383_s18, 1  ;;  %p59_p7 = scmp.eq.s32.totalorder %s56_s23, 0 }
   0xd   : > { %p645_p8 = por %p75_p5, %p74_p3  ;;  %p134_p10 = scmp.eq.s32.totalorder %s384_s19, 1 }
   0xe   : > { %p649_p9 = por %p128_p6, %p68_p1  ;;  %p413_p13 = scmp.lt.s32.totalorder %s573_s17, 2 }
   0xf   : > { %s654_s26 = scalar_select %p59_p7, %s561_s14, %s61_s21  }
  0x10   : > { %p656_p11 = por %p134_p10, %p74_p3  ;;  %s157_s28 = sand.u32 1, %s561_s14  }
  0x11   : > { %s387_s29 = sshll.u32 %s157_s28, 3  ;;  %s399_s30 = sshll.u32 %s569_s16, 7 }
  0x12   : > { %s747_s27 = scalar_select %p656_p11, 1, 0 }
  0x13   : > { %s169_s6 = scalar_lea.hbm %s741_s1, %s399_s30  ;;  %s161_s7 = scalar_lea.vmem [#allocation2], %s387_s29 }
  0x14   : > { %s171_s8 = sshll.u32 %s161_s7, 4  ;;  %p669_p0 = pnand %p413_p13, %p639_p4  ;;  %s172_s8 = int_to_ptr.vmem [resolvable:$true] %s171_s8 }
  0x15   : > { %p390_p1 = scmp.ge.s32.totalorder %s573_s17, 1  ;;  %p188_p2 = scmp.lt.s32.totalorder %s573_s17, 3 }
  0x16   : > { %s158_s10 = scalar_lea.sflag [#allocation3], %s157_s28  ;;  %p467_p3 = pneg %p669_p0 }
  0x17   : > { %s478_s11 = scalar_lea.vmem %s172_s8, 128  ;;  %s575_s18 = smov [#allocation2]  }
  0x18   : > { %p479_p5 = scmp.ne.s32.totalorder %s172_s8, %s478_s11  ;;  %s483_s19 = sshll.u32 %s575_s18, 4  ;;  %s484_s19 = int_to_ptr.vmem [resolvable:$false] %s483_s19 }
  0x19   : > { %s485_s21 = scalar_lea.vmem %s484_s19, 256  ;;  %p486_p10 = scmp.lt.s32.totalorder %s172_s8, %s484_s19 }
  0x1a   : > { %p481_p6 = pnand %p479_p5, %p467_p3  ;;  %p487_p12 = scmp.lt.s32.totalorder %s485_s21, %s478_s11 }
  0x1c   : > { %p482_p7 = pneg %p481_p6  ;;  %p488_p4 = por %p487_p12, %p486_p10 }
  0x1e   : > { %p489_p13 = pnand %p488_p4, %p482_p7 }
  0x20   : > { %492 = shalt.err (!%p489_p13)
}
  0x21   : > { %408 = dma.hbm_to_vmem [thread:$0]  (!%p669_p0), %s169_s6, 128, %s172_s8, %s158_s10  }
  0x22   : > { %p189_p11 = pnand %p390_p1, %p188_p2 }
  0x23   : > { %s684_s22 = sand.u32 (!%p189_p11), 1, %s557_s13  }
  0x24   : > { %192 = sbr.rel (%p189_p11) target bundleno = 187 (0xbb), region = 32  ;;  %s391_s23 = sshll.u32 (!%p189_p11), %s684_s22, 3 }
  0x25   : > { %s195_s28 = scalar_lea.sflag (!%p189_p11), [#allocation3], %s684_s22  ;;  %s198_s29 = scalar_lea.vmem (!%p189_p11), [#allocation2], %s391_s23 }
  0x29   : > { %544 = dma.done.wait (%p645_p8), %s195_s28, 128  }
  0x2a   : > { %546 = vsyncadd (%p645_p8), %s195_s28, 4294967168  ;;  %v576_v0 = vmov 0   ;;  %v240_v1 = vld [vmem:[%s740_s0] sm:$0xf]  ;;  %p231_p11 = scmp.lt.s32.totalorder %s565_s15, 1  ;;  %v249_v2 = vlaneseq  ;;  %v242_v12 = vld [vmem:[%s198_s29] sm:$0xff] }
  0x2b   : > { %464 = vset.pattern.permute.xlu0 %v576_v0  ;;  %s400_s9 = sshll.u32 %s565_s15, 7  ;;  %s228_s10 = scalar_lea.vmem [#allocation5], %s391_s23 }
  0x2c   : > { %245 = vperm.xlu0 %464, %v240_v1   ;;  %s232_s5 = scalar_select %p231_p11, %s565_s15, 1  ;;  %v250_v3 = vshrl.u32 %v249_v2, 7 }
  0x2d   : > { %s284_s11 = sshll.u32 %s228_s10, 4  ;;  %s282_s21 = scalar_lea.hbm %s743_s3, %s400_s9  ;;  %s285_s11 = int_to_ptr.vmem [resolvable:$true] %s284_s11 }
  0x2e   : > { %s393_s6 = sshll.u32 %s232_s5, 1  ;;  %v251_v4 = vsub.s32 0, %v250_v3  ;;  %v255_v5 = vsub.s32 1, %v250_v3  ;;  %s268_s28 = scalar_lea.sflag [#allocation4], %s684_s22 }
  0x2f   : > { %s237_s24 = scalar_lea.vmem %s742_s2, %s393_s6  ;;  %s493_s30 = scalar_lea.vmem %s285_s11, 128 }
  0x30   : > { %v241_v6 = vld [vmem:[%s237_s24] sm:$0x3]  ;;  %p494_p8 = scmp.ne.s32.totalorder %s285_s11, %s493_s30  ;;  %s577_s4 = smov [#allocation5]  }
  0x31   : > { %v252_v7 = vrot.slane %v241_v6, %v251_v4  ;;  %v256_v8 = vrot.slane %v241_v6, %v255_v5  ;;  %s497_s5 = sshll.u32 %s577_s4, 4  ;;  %s498_s5 = int_to_ptr.vmem [resolvable:$false] %s497_s5 }
  0x32   : > { %p495_p12 = pnand %p494_p8, %p649_p9  ;;  %s499_s15 = scalar_lea.vmem %s498_s5, 256 }
  0x33   : > { %p500_p1 = scmp.lt.s32.totalorder %s285_s11, %s498_s5  ;;  %p501_p2 = scmp.lt.s32.totalorder %s499_s15, %s493_s30 }
  0x34   : > { %p496_p0 = pneg %p495_p12 }
  0x35   : > { %p502_p3 = por %p501_p2, %p500_p1 }
  0x37   : > { %p503_p5 = pnand %p502_p3, %p496_p0 }
  0xa7   : > { %v246_v9 = vpop.permute.xlu0 %245 }
  0xa8   : > { %v259_v10 = vmul.f32 %v252_v7, %v246_v9  ;;  %v260_v11 = vmul.f32 %v256_v8, %v246_v9 }
  0xaa   : > { %v263_v13 = vcombine.low %v259_v10, %v260_v11 }
  0xac   : > { %v265_v14 = vadd.f32 %v263_v13, %v242_v12 }
  0xae   : > { %266 = vst [vmem:[%s228_s10] sm:$0xff] %v265_v14 }
  0xaf   : > { %506 = shalt.err (!%p503_p5)
}
  0xb0   : > { %s507_s23 = scalar_lea.hbm %s282_s21, 128  ;;  %s511_s6 = scalar_lea.hbm %s743_s3, 256 }
  0xb1   : > { %p508_p6 = scmp.ne.s32.totalorder %s282_s21, %s507_s23  ;;  %p512_p4 = scmp.lt.s32.totalorder %s282_s21, %s743_s3 }
  0xb2   : > { %p513_p13 = scmp.lt.s32.totalorder %s511_s6, %s507_s23 }
  0xb3   : > { %p509_p7 = pnand %p508_p6, %p649_p9 }
  0xb4   : > { %p514_p11 = por %p513_p13, %p512_p4 }
  0xb5   : > { %p510_p10 = pneg %p509_p7 }
  0xb7   : > { %p515_p8 = pnand %p514_p11, %p510_p10 }
  0xb9   : > { %518 = shalt.err (!%p515_p8)
}
  0xba   : > { %403 = dma.vmem_to_hbm [thread:$0]  (%p649_p9), %s285_s11, 128, %s282_s21, %s268_s28  }
  0xbb PF: > { %s296_s24 = sand.u32 1, %s553_s12   ;;  %p749_p12 = scmp.ne.s32.totalorder %s747_s27, 0 }
  0xbc   : > { %p750_p0 = scmp.ge.s32.totalorder %s573_s17, 2  ;;  %s297_s9 = scalar_lea.sflag [#allocation4], %s296_s24 }
  0xbe   : > { %p410_p1 = pnand %p750_p0, %p749_p12 }
  0xc0   : > { %p411_p2 = pneg %p410_p1 }
  0xc2   : > { %548 = dma.done.wait (%p411_p2), %s297_s9, 128  }
  0xc3   : > { %550 = vsyncadd (%p411_p2), %s297_s9, 4294967168  ;;  %s19_s17 = sadd.s32 1, %s573_s17   ;;  %s751_s12 = smov %s557_s13 }
  0xc4   : > { %p16_p3 = scmp.ge.s32.totalorder %s19_s17, 4   ;;  %s752_s13 = smov %s561_s14 }
  0xc5   : > { %s753_s14 = smov %s654_s26  ;;  %s754_s15 = smov %s569_s16 }
  0xc6   : > { %s755_s16 = smov %s757_s20  ;;  %18 = sbr.rel (!%p16_p3) target bundleno = 6 (0x6), region = 80 }
  0xcb   :  { %302 = vsyncpa [#allocation3], 1 }
  0xcc   :  { %304 = vsyncpa [#allocation3 + $0x1], 1 }
  0xcd   :  { %305 = vsyncpa [#allocation4], 1 }
  0xce   :  { %307 = vsyncpa [#allocation4 + $0x1], 1 }

</bundles_post_ra>
